<compile_context>
chip_gen: v7x
topology: tpu7x:2x2x1
jax: 0.10.0
libtpu: 0.0.40
codegen_flags: <defaults>
</compile_context>

<pallas_src>
import functools

import jax
import jax.numpy as jnp
from jax.experimental import pallas as pl
from jax.experimental.pallas import tpu as pltpu

_MiB = 1024 * 1024


def _round_up(v, m):
    return ((v + m - 1) // m) * m


@functools.lru_cache(maxsize=1)
def _device_vmem_bytes():
    """Physical VMEM per TensorCore; conservative 64 MiB (v7x) fallback."""
    try:
        info = pltpu.get_tpu_info()
        for name in ("vmem_capacity_bytes", "vmem_size_bytes", "vmem_bytes"):
            v = getattr(info, name, None)
            if v:
                return int(v)
    except Exception:
        pass
    try:
        kind = jax.devices()[0].device_kind.lower()
        if "v5" in kind or "v6" in kind:
            return 128 * _MiB
    except Exception:
        pass
    return 64 * _MiB


# --------------------------------------------------------------------------
# Fast path: whole problem resident in VMEM, single invocation (no grid).
# --------------------------------------------------------------------------
def _linear_single_kernel(x_ref, w_ref, b_ref, o_ref, *, compute_dtype):
    acc = jnp.dot(
        x_ref[...].astype(compute_dtype),
        w_ref[...].astype(compute_dtype),
        preferred_element_type=jnp.float32,
    )
    o_ref[...] = (acc + b_ref[...]).astype(o_ref.dtype)


# --------------------------------------------------------------------------
# Tiled path, f32 output: accumulate straight into the resident output block
# (bias folded into the k==0 init; no scratch, no epilogue copy).
# --------------------------------------------------------------------------
def _linear_tiled_f32out_kernel(x_ref, w_ref, b_ref, o_ref, *, compute_dtype):
    k = pl.program_id(2)

    @pl.when(k == 0)
    def _():
        o_ref[...] = jnp.broadcast_to(b_ref[...], o_ref.shape)

    o_ref[...] += jnp.dot(
        x_ref[...].astype(compute_dtype),
        w_ref[...].astype(compute_dtype),
        preferred_element_type=jnp.float32,
    )


# --------------------------------------------------------------------------
# Tiled path, non-f32 output: f32 VMEM scratch accumulator, cast on last k.
# --------------------------------------------------------------------------
def _linear_tiled_castout_kernel(x_ref, w_ref, b_ref, o_ref, acc_ref, *, compute_dtype):
    k = pl.program_id(2)

    @pl.when(k == 0)
    def _():
        acc_ref[...] = jnp.broadcast_to(b_ref[...], acc_ref.shape)

    acc_ref[...] += jnp.dot(
        x_ref[...].astype(compute_dtype),
        w_ref[...].astype(compute_dtype),
        preferred_element_type=jnp.float32,
    )

    @pl.when(k == pl.num_programs(2) - 1)
    def _():
        o_ref[...] = acc_ref[...].astype(o_ref.dtype)


@functools.partial(
    jax.jit,
    static_argnames=("compute_dtype", "out_dtype", "use_single_block", "tile_caps"),
)
def linear_adapter_forward(
    x,
    w_t,
    b,
    *,
    compute_dtype="auto",
    out_dtype=jnp.float32,
    use_single_block=None,
    tile_caps=None,
):
    """y = x @ w_t + b.  x: [M, K], w_t: [K, N] (PyTorch weight transposed), b: [N].

    compute_dtype="auto": bf16 MXU compute (f32 accumulate) on the tiled path;
    the tiny fast path keeps input precision unless weights are already bf16.
    Weights should be stored bf16 at rest by the caller for HBM savings; no
    dtype casts are performed in the wrapper.
    """
    M, K = x.shape
    K2, N = w_t.shape
    assert K == K2, "x / weight inner-dim mismatch"
    out_dtype = jnp.dtype(out_dtype)

    b2d = b.reshape(1, N).astype(jnp.float32)

    x_i = jnp.dtype(x.dtype).itemsize
    w_i = jnp.dtype(w_t.dtype).itemsize
    o_i = out_dtype.itemsize

    vmem_bytes = _device_vmem_bytes()
    # Generation-aware working-set budget (double-buffered tiles):
    #   v5e/v6e (128 MiB VMEM) -> 48 MiB, v7x (64 MiB) -> ~28 MiB.
    tiled_budget = min(48 * _MiB, int(vmem_bytes * 0.45))

    total_bytes = M * K * x_i + K * N * w_i + N * 4 + M * N * o_i
    fast_limit = min(2 * _MiB, tiled_budget // 4)
    if use_single_block is None:
        use_single_block = total_bytes <= fast_limit
    # Never honor a forced fast path whose footprint can't comfortably sit in VMEM.
    use_single_block = bool(use_single_block) and total_bytes <= min(8 * _MiB, tiled_budget)

    if compute_dtype == "auto":
        if use_single_block:
            # Tiny / DMA-and-overhead-bound regime: keep input precision unless
            # the weights are already bf16 at rest.
            cd = (
                jnp.bfloat16
                if (w_t.dtype == jnp.bfloat16 or x.dtype == jnp.bfloat16)
                else jnp.float32
            )
        else:
            cd = jnp.bfloat16  # MXU-native compute for the big tiled path
    else:
        cd = compute_dtype
    cd = jnp.dtype(cd)

    # ---- fast path: single un-gridded call, everything in VMEM ----
    if use_single_block:
        return pl.pallas_call(
            functools.partial(_linear_single_kernel, compute_dtype=cd),
            out_shape=jax.ShapeDtypeStruct((M, N), out_dtype),
        )(x, w_t, b2d)

    # ---- tiled path ----
    sub_x = 16 if x_i < 4 else 8  # sublane packing of the x tile's leading dim

    if tile_caps is None:
        tm_cap, tn_cap, tk_cap = 512, 1024, 2048
    else:
        tm_cap, tn_cap, tk_cap = tile_caps
    tm_cap = _round_up(tm_cap, sub_x)
    tn_cap = _round_up(tn_cap, 128)
    tk_cap = _round_up(tk_cap, 128)

    tm = min(tm_cap, _round_up(M, sub_x))
    tn = min(tn_cap, _round_up(N, 128))
    tk = min(tk_cap, _round_up(K, 128))

    def footprint(tm_, tn_, tk_):
        inp = 2 * (tm_ * tk_ * x_i + tk_ * tn_ * w_i + tn_ * 4)  # double-buffered inputs
        out = 2 * tm_ * tn_ * o_i
        acc = tm_ * tn_ * 4 if out_dtype != jnp.float32 else 0
        cast = (tm_ * tk_ + tk_ * tn_) * 2 if (cd != x.dtype or cd != w_t.dtype) else 0
        return inp + out + acc + cast

    # Shrink tk, then tn, then tm until the working set fits the per-gen budget.
    while footprint(tm, tn, tk) > tiled_budget and tk > 512:
        tk = _round_up(tk // 2, 128)
    while footprint(tm, tn, tk) > tiled_budget and tn > 256:
        tn = _round_up(tn // 2, 128)
    while footprint(tm, tn, tk) > tiled_budget and tm > max(sub_x, 64):
        tm = _round_up(tm // 2, sub_x)

    # Megacore: if the whole problem fits one (i, j) block, split N into two
    # "parallel" blocks so a second TensorCore (v7x) gets work; on 1-TC chips
    # this only adds one ~0.35 us grid step.
    if _round_up(M, tm) == tm and _round_up(N, tn) == tn and tn >= 256:
        tn = max(128, _round_up(tn // 2, 128))

    # Pad ragged dims to the tile grid (zero padding is exact for the matmul).
    Mp, Np, Kp = _round_up(M, tm), _round_up(N, tn), _round_up(K, tk)
    if Mp != M or Kp != K:
        x = jnp.pad(x, ((0, Mp - M), (0, Kp - K)))
    if Kp != K or Np != N:
        w_t = jnp.pad(w_t, ((0, Kp - K), (0, Np - N)))
    if Np != N:
        b2d = jnp.pad(b2d, ((0, 0), (0, Np - N)))

    grid = (Mp // tm, Np // tn, Kp // tk)

    if out_dtype == jnp.float32:
        kern = functools.partial(_linear_tiled_f32out_kernel, compute_dtype=cd)
        scratch = ()
    else:
        kern = functools.partial(_linear_tiled_castout_kernel, compute_dtype=cd)
        scratch = (pltpu.VMEM((tm, tn), jnp.float32),)

    fp = footprint(tm, tn, tk)
    vmem_limit = int(min(max(int(1.5 * fp), 32 * _MiB), int(vmem_bytes * 0.75)))

    out = pl.pallas_call(
        kern,
        out_shape=jax.ShapeDtypeStruct((Mp, Np), out_dtype),
        grid_spec=pltpu.PrefetchScalarGridSpec(
            num_scalar_prefetch=0,
            grid=grid,
            in_specs=[
                pl.BlockSpec((tm, tk), lambda i, j, k: (i, k)),  # x tile
                pl.BlockSpec((tk, tn), lambda i, j, k: (k, j)),  # w_t tile
                pl.BlockSpec((1, tn), lambda i, j, k: (0, j)),   # bias (j only)
            ],
            out_specs=pl.BlockSpec((tm, tn), lambda i, j, k: (i, j)),
            scratch_shapes=scratch,
        ),
        compiler_params=pltpu.CompilerParams(
            dimension_semantics=("parallel", "parallel", "arbitrary"),
            vmem_limit_bytes=vmem_limit,
        ),
    )(x, w_t, b2d)

    if Mp != M or Np != N:
        out = out[:M, :N]
    return out


if __name__ == "__main__":
    key = jax.random.PRNGKey(0)
    kx, kw, kb, kx2, kw2, kb2 = jax.random.split(key, 6)

    # ---- production adapter regime: LinearAdapter(input_dim=256, adapter_dim=384) ----
    batch, input_dim, adapter_dim = 8, 256, 384
    bound = 1.0 / (input_dim ** 0.5)
    # PyTorch weight is [adapter_dim, input_dim]; store transposed for the kernel.
    w = jax.random.uniform(kw, (adapter_dim, input_dim), jnp.float32, -bound, bound)
    b = jax.random.uniform(kb, (adapter_dim,), jnp.float32, -bound, bound)
    w_t = w.T  # [input_dim, adapter_dim]
    x = jax.random.normal(kx, (batch, input_dim), jnp.float32)
    y_ref = x @ w_t + b

    # (1) f32 params, single-block fast path -> exact.
    y = jax.block_until_ready(linear_adapter_forward(x, w_t, b))
    assert y.shape == (batch, adapter_dim) and y.dtype == jnp.float32
    assert jnp.allclose(y, y_ref, atol=1e-5, rtol=1e-5), "f32 fast path mismatch"

    # (2) bf16-at-rest weights (recommended storage): half the weight HBM bytes,
    #     cast happens per-tile in VMEM - never in the wrapper.
    w_t_bf16 = w_t.astype(jnp.bfloat16)  # one-time, at "checkpoint load" time
    y_bf = jax.block_until_ready(linear_adapter_forward(x, w_t_bf16, b))
    assert jnp.allclose(y_bf, y_ref, atol=5e-2, rtol=5e-2), "bf16 weight path mismatch"

    # ---- tiled path: ragged moderate shape, forced off the fast path ----
    M, K, N = 200, 1000, 500  # ragged on purpose: exercises pad-and-slice
    bound2 = 1.0 / (K ** 0.5)
    x2 = jax.random.normal(kx2, (M, K), jnp.float32)
    w2_t = jax.random.uniform(kw2, (K, N), jnp.float32, -bound2, bound2)
    b2 = jax.random.uniform(kb2, (N,), jnp.float32, -bound2, bound2)
    y2_ref = x2 @ w2_t + b2

    # (3) default tiled path: bf16 MXU compute, f32 accumulate, f32 out, 2x2x2 grid.
    y2 = jax.block_until_ready(
        linear_adapter_forward(
            x2, w2_t, b2, use_single_block=False, tile_caps=(128, 256, 512)
        )
    )
    assert y2.shape == (M, N)
    assert jnp.allclose(y2, y2_ref, atol=5e-2, rtol=5e-2), "bf16 tiled path mismatch"

    # (4) exact f32 compute on the tiled path.
    y2_f32 = jax.block_until_ready(
        linear_adapter_forward(
            x2, w2_t, b2, compute_dtype=jnp.float32,
            use_single_block=False, tile_caps=(128, 256, 512)
        )
    )
    assert jnp.allclose(y2_f32, y2_ref, atol=1e-3, rtol=1e-3), "f32 tiled path mismatch"

    # (5) bf16 output (f32 scratch accumulator, cast on the last k step).
    y2_bf16out = jax.block_until_ready(
        linear_adapter_forward(
            x2, w2_t, b2, out_dtype=jnp.bfloat16,
            use_single_block=False, tile_caps=(128, 256, 512)
        )
    )
    assert y2_bf16out.dtype == jnp.bfloat16
    assert jnp.allclose(
        y2_bf16out.astype(jnp.float32), y2_ref, atol=5e-2, rtol=5e-2
    ), "bf16-out tiled path mismatch"

    print("KERNEL_OK")
</pallas_src>

<mosaic_0001>
module attributes {stable_mosaic.version = 11 : i64} {
  func.func @_linear_single_kernel(%arg0: memref<8x256xf32, #tpu.memory_space<vmem>>, %arg1: memref<256x384xf32, #tpu.memory_space<vmem>>, %arg2: memref<1x384xf32, #tpu.memory_space<vmem>>, %arg3: memref<8x384xf32, #tpu.memory_space<vmem>>) attributes {dimension_semantics = [], scalar_prefetch = 0 : i64, scratch_operands = 0 : i64, tpu.core_type = #tpu.core_type<tc>} {
    %c0 = arith.constant 0 : index
    %c0_0 = arith.constant 0 : index
    %0 = vector.load %arg0[%c0, %c0_0] : memref<8x256xf32, #tpu.memory_space<vmem>>, vector<8x256xf32>
    %c0_1 = arith.constant 0 : index
    %c0_2 = arith.constant 0 : index
    %1 = vector.load %arg1[%c0_1, %c0_2] : memref<256x384xf32, #tpu.memory_space<vmem>>, vector<256x384xf32>
    %cst = arith.constant dense<0.000000e+00> : vector<8x384xf32>
    %2 = tpu.matmul %0, %1, %cst {dimension_numbers = #tpu.dot_dimension_numbers<[1], [0], [0], [1], [0, 0, 1, 1], [], []>} : vector<8x256xf32>, vector<256x384xf32>, vector<8x384xf32> -> vector<8x384xf32>
    %c0_3 = arith.constant 0 : index
    %c0_4 = arith.constant 0 : index
    %3 = vector.load %arg2[%c0_3, %c0_4] : memref<1x384xf32, #tpu.memory_space<vmem>>, vector<1x384xf32>
    %4 = vector.broadcast %3 : vector<1x384xf32> to vector<8x384xf32>
    %5 = arith.addf %2, %4 : vector<8x384xf32>
    %c0_5 = arith.constant 0 : index
    %c0_6 = arith.constant 0 : index
    %6 = vector.load %arg3[%c0_5, %c0_6] : memref<8x384xf32, #tpu.memory_space<vmem>>, vector<8x384xf32>
    tpu.vector_store %arg3[%c0_5, %c0_6], %5 {strides = array<i32>} : memref<8x384xf32, #tpu.memory_space<vmem>>, vector<8x384xf32>,
    return
  }
}

</mosaic_0001>

<bundles_post_ra>
// kernel: linear_adapter_forward.1
= control target key start
LH: loop header
LB: loop body
LE: loop exit
PB: predicated region body
PF: predicated region fallthrough
CT: control target
= control target key end

     0   :  { %8 = vsyncpa [#allocation3], 0  ;;  %s595_s0 = inlined_call_operand.hbm [shape: f32[8,256], index: 0, kind: input, shape index: {}]   ;;  %s596_s1 = inlined_call_operand.hbm [shape: f32[256,384], index: 1, kind: input, shape index: {}]   ;;  %s597_s2 = inlined_call_operand.vmem [shape: f32[1,384], index: 2, kind: input, shape index: {}]   ;;  %s598_s3 = inlined_call_operand.hbm [shape: f32[8,384], index: 3, kind: output, shape index: {}]  }
   0x1   :  { %9 = vsyncpa [#allocation6], 0 }
   0x2   :  { %10 = vsyncpa [#allocation4], 0  ;;  %s524_s12 = smov [#allocation2]   ;;  %s525_s14 = smov [#allocation5]  }
   0x3   :  { %s17_s13 = sshll.u32 %s524_s12, 4  ;;  %s26_s15 = sshll.u32 %s525_s14, 4  ;;  %s18_s13 = int_to_ptr.vmem [resolvable:$true] %s17_s13  ;;  %s549_s15 = int_to_ptr.vmem [resolvable:$true] %s26_s15 }
   0x4   :  { %s452_s18 = scalar_lea.hbm %s595_s0, 256 }
   0x5   :  { %p453_p0 = scmp.ne.s32.totalorder %s595_s0, %s452_s18  ;;  %p456_p1 = scmp.lt.u32.totalorder %s452_s18, %s595_s0 }
   0x7   :  { %p458_p2 = pnand %p456_p1, %p453_p0 }
   0x9   :  { %461 = shalt.err (!%p458_p2)
}
   0xa   :  { %s462_s23 = scalar_lea.vmem %s18_s13, 256  ;;  %p467_p4 = scmp.lt.s32.totalorder %s18_s13, %s18_s13 }
   0xb   :  { %p463_p3 = scmp.ne.s32.totalorder %s18_s13, %s462_s23  ;;  %p468_p5 = scmp.lt.s32.totalorder %s462_s23, %s462_s23 }
   0xd   :  { %p469_p6 = por %p468_p5, %p467_p4 }
   0xf   :  { %p470_p7 = pnand %p469_p6, %p463_p3 }
  0x11   :  { %473 = shalt.err (!%p470_p7)
}
  0x12   :  { %20 = dma.hbm_to_vmem [thread:$0]  %s595_s0, 256, %s18_s13, [#allocation3]  }
  0x13   :  { %s474_s28 = scalar_lea.hbm %s596_s1, 12288 }
  0x14   :  { %p475_p8 = scmp.ne.s32.totalorder %s596_s1, %s474_s28  ;;  %p478_p9 = scmp.lt.u32.totalorder %s474_s28, %s596_s1 }
  0x16   :  { %p480_p10 = pnand %p478_p9, %p475_p8 }
  0x18   :  { %483 = shalt.err (!%p480_p10)
}
  0x19   :  { %s484_s6 = scalar_lea.vmem %s549_s15, 12288  ;;  %p489_p12 = scmp.lt.s32.totalorder %s549_s15, %s549_s15 }
  0x1a   :  { %p485_p11 = scmp.ne.s32.totalorder %s549_s15, %s484_s6  ;;  %p490_p13 = scmp.lt.s32.totalorder %s484_s6, %s484_s6 }
  0x1c   :  { %p491_p0 = por %p490_p13, %p489_p12 }
  0x1e   :  { %p492_p1 = pnand %p491_p0, %p485_p11 }
  0x20   :  { %495 = shalt.err (!%p492_p1)
}
  0x21   :  { %s526_s0 = smov 384   ;;  %s527_s7 = smov 24  }
  0x22   :  { %32 = dma.hbm_to_vmem [thread:$0]  %s596_s1, 12288, %s549_s15, [#allocation6], %s526_s0, %s526_s0, %s527_s7  }
  0x23   :  { %518 = dma.done.wait [#allocation3], 256  }
  0x24   :  { %519 = vsyncadd [#allocation3], 4294967040 }
  0x25   :  { %520 = dma.done.wait [#allocation6], 12288  }
  0x26   :  { %521 = vsyncadd [#allocation6], 4294955008  ;;  %v44_v0 = vld [vmem:[#allocation5 + $0x8] sm:$0xff]  ;;  %v47_v1 = vld [vmem:[#allocation5 + $0x20] sm:$0xff]  ;;  %s528_s11 = smov [#allocation7]  }
  0x27   :  { %v43_v2 = vld [vmem:[#allocation5] sm:$0xff]  ;;  %v351_v3 = vpack.c.bf16 %v47_v1, %v44_v0  ;;  %v46_v4 = vld [vmem:[#allocation5 + $0x18] sm:$0xff]  ;;  %v53_v6 = vld [vmem:[#allocation5 + $0x50] sm:$0xff]  ;;  %s306_s12 = sshll.u32 %s528_s11, 4  ;;  %s307_s12 = int_to_ptr.vmem [resolvable:$true] %s306_s12 }
  0x28   :  { %v50_v5 = vld [vmem:[#allocation5 + $0x38] sm:$0xff]  ;;  %v353_v7 = vpack.c.bf16 %v46_v4, %v43_v2  ;;  %v49_v9 = vld [vmem:[#allocation5 + $0x30] sm:$0xff]  ;;  %v52_v10 = vld [vmem:[#allocation5 + $0x48] sm:$0xff]  ;;  %p501_p3 = scmp.lt.s32.totalorder %s307_s12, %s307_s12 }
  0x29   :  { %v355_v8 = vpack.c.bf16 %v53_v6, %v50_v5  ;;  %v56_v11 = vld [vmem:[#allocation5 + $0x68] sm:$0xff]  ;;  %352 = vmatprep.subr.bf16.mxu0 %v351_v3  ;;  %v59_v12 = vld [vmem:[#allocation5 + $0x80] sm:$0xff]  ;;  %v357_v13 = vpack.c.bf16 %v52_v10, %v49_v9  ;;  %v58_v16 = vld [vmem:[#allocation5 + $0x78] sm:$0xff] }
  0x2a   :  { %354 = vmatpush1.bf16.msra.mxu0 %v353_v7  ;;  %v359_v14 = vpack.c.bf16 %v59_v12, %v56_v11  ;;  %v55_v15 = vld [vmem:[#allocation5 + $0x60] sm:$0xff]  ;;  %v62_v17 = vld [vmem:[#allocation5 + $0x98] sm:$0xff]  ;;  %v65_v18 = vld [vmem:[#allocation5 + $0xb0] sm:$0xff] }
  0x2b   :  { %356 = vmatprep.subr.bf16.mxu0 %v355_v8  ;;  %v361_v19 = vpack.c.bf16 %v58_v16, %v55_v15  ;;  %v363_v20 = vpack.c.bf16 %v65_v18, %v62_v17  ;;  %v61_v21 = vld [vmem:[#allocation5 + $0x90] sm:$0xff]  ;;  %v64_v22 = vld [vmem:[#allocation5 + $0xa8] sm:$0xff]  ;;  %v71_v24 = vld [vmem:[#allocation5 + $0xe0] sm:$0xff] }
  0x2c   :  { %v68_v23 = vld [vmem:[#allocation5 + $0xc8] sm:$0xff]  ;;  %v93_v25 = vld [vmem:[#allocation5 + $0x190] sm:$0xff]  ;;  %v365_v29 = vpack.c.bf16 %v64_v22, %v61_v21  ;;  %v67_v30 = vld [vmem:[#allocation5 + $0xc0] sm:$0xff] }
  0x2d   :  { %v96_v26 = vld [vmem:[#allocation5 + $0x1a8] sm:$0xff]  ;;  %v45_v27 = vld [vmem:[#allocation5 + $0x10] sm:$0xff]  ;;  %v70_v31 = vld [vmem:[#allocation5 + $0xd8] sm:$0xff]  ;;  %v367_v34 = vpack.c.bf16 %v71_v24, %v68_v23 }
  0x2e   :  { %358 = vmatpush1.bf16.msra.mxu0 %v357_v13  ;;  %v48_v28 = vld [vmem:[#allocation5 + $0x28] sm:$0xff]  ;;  %v415_v32 = vpack.c.bf16 %v96_v26, %v93_v25  ;;  %v74_v35 = vld [vmem:[#allocation5 + $0xf8] sm:$0xff]  ;;  %v99_v36 = vld [vmem:[#allocation5 + $0x1c0] sm:$0xff]  ;;  %v369_v43 = vpack.c.bf16 %v70_v31, %v67_v30 }
  0x2f   :  { %360 = vmatprep.subr.bf16.mxu0 %v359_v14  ;;  %v417_v33 = vpack.c.bf16 %v48_v28, %v45_v27  ;;  %v102_v37 = vld [vmem:[#allocation5 + $0x1d8] sm:$0xff]  ;;  %v77_v38 = vld [vmem:[#allocation5 + $0x110] sm:$0xff]  ;;  %v51_v40 = vld [vmem:[#allocation5 + $0x40] sm:$0xff] }
  0x30   :  { %416 = vmatprep.subr.bf16.mxu1 %v415_v32  ;;  %v419_v39 = vpack.c.bf16 %v102_v37, %v99_v36  ;;  %v54_v41 = vld [vmem:[#allocation5 + $0x58] sm:$0xff]  ;;  %v105_v44 = vld [vmem:[#allocation5 + $0x1f0] sm:$0xff]  ;;  %v108_v45 = vld [vmem:[#allocation5 + $0x208] sm:$0xff]  ;;  %v371_v47 = vpack.c.bf16 %v77_v38, %v74_v35 }
  0x31   :  { %418 = vmatpush3.bf16.msra.mxu1 %v417_v33  ;;  %v421_v42 = vpack.c.bf16 %v54_v41, %v51_v40  ;;  %v57_v46 = vld [vmem:[#allocation5 + $0x70] sm:$0xff]  ;;  %v76_v49 = vld [vmem:[#allocation5 + $0x108] sm:$0xff]  ;;  %v423_v50 = vpack.c.bf16 %v108_v45, %v105_v44  ;;  %v83_v53 = vld [vmem:[#allocation5 + $0x140] sm:$0xff] }
  0x32   :  { %362 = vmatpush1.bf16.msra.mxu0 %v361_v19  ;;  %420 = vmatprep.subr.bf16.mxu1 %v419_v39  ;;  %v73_v48 = vld [vmem:[#allocation5 + $0xf0] sm:$0xff]  ;;  %v60_v51 = vld [vmem:[#allocation5 + $0x88] sm:$0xff]  ;;  %v111_v54 = vld [vmem:[#allocation5 + $0x220] sm:$0xff] }
  0x33   :  { %364 = vmatprep.subr.bf16.mxu0 %v363_v20  ;;  %v80_v52 = vld [vmem:[#allocation5 + $0x128] sm:$0xff]  ;;  %v425_v55 = vpack.c.bf16 %v60_v51, %v57_v46  ;;  %v114_v56 = vld [vmem:[#allocation5 + $0x238] sm:$0xff]  ;;  %v373_v57 = vpack.c.bf16 %v76_v49, %v73_v48  ;;  %v79_v58 = vld [vmem:[#allocation5 + $0x120] sm:$0xff] }
  0x34   :  { %v427_v59 = vpack.c.bf16 %v114_v56, %v111_v54  ;;  %v63_v60 = vld [vmem:[#allocation5 + $0xa0] sm:$0xff]  ;;  %v66_v61 = vld [vmem:[#allocation5 + $0xb8] sm:$0xff]  ;;  %v375_v62 = vpack.c.bf16 %v83_v53, %v80_v52  ;;  %v117_v0 = vld [vmem:[#allocation5 + $0x250] sm:$0xff] }
  0x35   :  { %422 = vmatpush3.bf16.msra.mxu1 %v421_v42  ;;  %v82_v63 = vld [vmem:[#allocation5 + $0x138] sm:$0xff]  ;;  %v120_v1 = vld [vmem:[#allocation5 + $0x268] sm:$0xff]  ;;  %v89_v3 = vld [vmem:[#allocation5 + $0x170] sm:$0xff]  ;;  %v429_v4 = vpack.c.bf16 %v66_v61, %v63_v60 }
  0x36   :  { %366 = vmatpush1.bf16.msra.mxu0 %v365_v29  ;;  %424 = vmatprep.subr.bf16.mxu1 %v423_v50  ;;  %v86_v2 = vld [vmem:[#allocation5 + $0x158] sm:$0xff]  ;;  %v377_v5 = vpack.c.bf16 %v82_v63, %v79_v58  ;;  %v85_v6 = vld [vmem:[#allocation5 + $0x150] sm:$0xff]  ;;  %v431_v7 = vpack.c.bf16 %v120_v1, %v117_v0  ;;  %v72_v9 = vld [vmem:[#allocation5 + $0xe8] sm:$0xff] }
  0x37   :  { %368 = vmatprep.subr.bf16.mxu0 %v367_v34  ;;  %v69_v8 = vld [vmem:[#allocation5 + $0xd0] sm:$0xff]  ;;  %v379_v10 = vpack.c.bf16 %v89_v3, %v86_v2  ;;  %v88_v11 = vld [vmem:[#allocation5 + $0x168] sm:$0xff]  ;;  %v123_v12 = vld [vmem:[#allocation5 + $0x280] sm:$0xff] }
  0x38   :  { %v126_v13 = vld [vmem:[#allocation5 + $0x298] sm:$0xff]  ;;  %v92_v14 = vld [vmem:[#allocation5 + $0x188] sm:$0xff]  ;;  %v95_v15 = vld [vmem:[#allocation5 + $0x1a0] sm:$0xff]  ;;  %v433_v16 = vpack.c.bf16 %v72_v9, %v69_v8  ;;  %v381_v17 = vpack.c.bf16 %v88_v11, %v85_v6 }
  0x39   :  { %426 = vmatpush3.bf16.msra.mxu1 %v425_v55  ;;  %v91_v18 = vld [vmem:[#allocation5 + $0x180] sm:$0xff]  ;;  %v435_v19 = vpack.c.bf16 %v126_v13, %v123_v12  ;;  %v78_v21 = vld [vmem:[#allocation5 + $0x118] sm:$0xff]  ;;  %v383_v22 = vpack.c.bf16 %v95_v15, %v92_v14  ;;  %v129_v24 = vld [vmem:[#allocation5 + $0x2b0] sm:$0xff] }
  0x3a   :  { %370 = vmatpush1.bf16.msra.mxu0 %v369_v43  ;;  %428 = vmatprep.subr.bf16.mxu1 %v427_v59  ;;  %v75_v20 = vld [vmem:[#allocation5 + $0x100] sm:$0xff]  ;;  %v94_v23 = vld [vmem:[#allocation5 + $0x198] sm:$0xff]  ;;  %v132_v25 = vld [vmem:[#allocation5 + $0x2c8] sm:$0xff] }
  0x3b   :  { %372 = vmatprep.subr.bf16.mxu0 %v371_v47  ;;  %v98_v26 = vld [vmem:[#allocation5 + $0x1b8] sm:$0xff]  ;;  %v101_v27 = vld [vmem:[#allocation5 + $0x1d0] sm:$0xff]  ;;  %v437_v28 = vpack.c.bf16 %v78_v21, %v75_v20  ;;  %v385_v30 = vpack.c.bf16 %v94_v23, %v91_v18  ;;  %v439_v32 = vpack.c.bf16 %v132_v25, %v129_v24  ;;  %v84_v34 = vld [vmem:[#allocation5 + $0x148] sm:$0xff]  ;;  %v141_v18 = vlaneseq }
  0x3c   :  { %v42_v29 = vld [vmem:[#allocation2 + $0x8] sm:$0xff]  ;;  %v97_v31 = vld [vmem:[#allocation5 + $0x1b0] sm:$0xff]  ;;  %v387_v35 = vpack.c.bf16 %v101_v27, %v98_v26  ;;  %v100_v36 = vld [vmem:[#allocation5 + $0x1c8] sm:$0xff] }
  0x3d   :  { %430 = vmatpush3.bf16.msra.mxu1 %v429_v4  ;;  %v81_v33 = vld [vmem:[#allocation5 + $0x130] sm:$0xff]  ;;  %v135_v37 = vld [vmem:[#allocation5 + $0x2e0] sm:$0xff]  ;;  %v138_v38 = vld [vmem:[#allocation5 + $0x2f8] sm:$0xff]  ;;  %291 = vmatprep.mubr.f32.mxu1 %v42_v29  ;;  %v389_v42 = vpack.c.bf16 %v100_v36, %v97_v31 }
  0x3e   :  { %374 = vmatpush1.bf16.msra.mxu0 %v373_v57  ;;  %432 = vmatprep.subr.bf16.mxu1 %v431_v7  ;;  %v104_v39 = vld [vmem:[#allocation5 + $0x1e8] sm:$0xff]  ;;  %v107_v40 = vld [vmem:[#allocation5 + $0x200] sm:$0xff]  ;;  %v441_v41 = vpack.c.bf16 %v84_v34, %v81_v33  ;;  %v443_v43 = vpack.c.bf16 %v138_v38, %v135_v37  ;;  %v90_v45 = vld [vmem:[#allocation5 + $0x178] sm:$0xff] }
  0x3f   :  { %376 = vmatprep.subr.bf16.mxu0 %v375_v62  ;;  %220 = vmatprep.mubr.f32.mxu0 %v42_v29  ;;  %v87_v44 = vld [vmem:[#allocation5 + $0x160] sm:$0xff]  ;;  %v391_v46 = vpack.c.bf16 %v107_v40, %v104_v39  ;;  %v106_v48 = vld [vmem:[#allocation5 + $0x1f8] sm:$0xff]  ;;  %v113_v50 = vld [vmem:[#allocation5 + $0x230] sm:$0xff] }
  0x40   :  { %v103_v47 = vld [vmem:[#allocation5 + $0x1e0] sm:$0xff]  ;;  %v110_v49 = vld [vmem:[#allocation5 + $0x218] sm:$0xff]  ;;  %v445_v51 = vpack.c.bf16 %v90_v45, %v87_v44  ;;  %v109_v54 = vld [vmem:[#allocation5 + $0x210] sm:$0xff] }
  0x41   :  { %434 = vmatpush3.bf16.msra.mxu1 %v433_v16  ;;  %v393_v52 = vpack.c.bf16 %v106_v48, %v103_v47  ;;  %v395_v53 = vpack.c.bf16 %v113_v50, %v110_v49  ;;  %v112_v55 = vld [vmem:[#allocation5 + $0x228] sm:$0xff]  ;;  %v119_v57 = vld [vmem:[#allocation5 + $0x260] sm:$0xff]  ;;  %v41_v58 = vld [vmem:[#allocation2] sm:$0xff] }
  0x42   :  { %378 = vmatpush1.bf16.msra.mxu0 %v377_v5  ;;  %436 = vmatprep.subr.bf16.mxu1 %v435_v19  ;;  %v116_v56 = vld [vmem:[#allocation5 + $0x248] sm:$0xff]  ;;  %v397_v59 = vpack.c.bf16 %v112_v55, %v109_v54  ;;  %v115_v61 = vld [vmem:[#allocation5 + $0x240] sm:$0xff]  ;;  %v118_v62 = vld [vmem:[#allocation5 + $0x258] sm:$0xff]  ;;  %v142_v19 = vshrl.u32 %v141_v18, 7 }
  0x43   :  { %380 = vmatprep.subr.bf16.mxu0 %v379_v10  ;;  %v399_v60 = vpack.c.bf16 %v119_v57, %v116_v56  ;;  %v122_v63 = vld [vmem:[#allocation5 + $0x278] sm:$0xff]  ;;  %v125_v0 = vld [vmem:[#allocation5 + $0x290] sm:$0xff]  ;;  %v401_v1 = vpack.c.bf16 %v118_v62, %v115_v61  ;;  %v124_v4 = vld [vmem:[#allocation5 + $0x288] sm:$0xff] }
  0x44   :  { %v403_v2 = vpack.c.bf16 %v125_v0, %v122_v63  ;;  %v121_v3 = vld [vmem:[#allocation5 + $0x270] sm:$0xff]  ;;  %v128_v5 = vld [vmem:[#allocation5 + $0x2a8] sm:$0xff]  ;;  %v131_v6 = vld [vmem:[#allocation5 + $0x2c0] sm:$0xff]  ;;  %v151_v20 = vsub.s32 2, %v142_v19  ;;  %v143_v27 = vsub.s32 0, %v142_v19 }
  0x45   :  { %438 = vmatpush3.bf16.msra.mxu1 %v437_v28  ;;  %v405_v7 = vpack.c.bf16 %v124_v4, %v121_v3  ;;  %v407_v8 = vpack.c.bf16 %v131_v6, %v128_v5  ;;  %v127_v9 = vld [vmem:[#allocation5 + $0x2a0] sm:$0xff]  ;;  %v130_v10 = vld [vmem:[#allocation5 + $0x2b8] sm:$0xff]  ;;  %v137_v12 = vld [vmem:[#allocation5 + $0x2f0] sm:$0xff]  ;;  %v147_v28 = vsub.s32 1, %v142_v19 }
  0x46   :  { %382 = vmatpush1.bf16.msra.mxu0 %v381_v17  ;;  %440 = vmatprep.subr.bf16.mxu1 %v439_v32  ;;  %v134_v11 = vld [vmem:[#allocation5 + $0x2d8] sm:$0xff]  ;;  %v409_v13 = vpack.c.bf16 %v130_v10, %v127_v9  ;;  %v133_v15 = vld [vmem:[#allocation5 + $0x2d0] sm:$0xff]  ;;  %v136_v16 = vld [vmem:[#allocation5 + $0x2e8] sm:$0xff] }
  0x47   :  { %384 = vmatprep.subr.bf16.mxu0 %v383_v22  ;;  %v411_v14 = vpack.c.bf16 %v137_v12, %v134_v11  ;;  %v413_v17 = vpack.c.bf16 %v136_v16, %v133_v15  ;;  %v139_v21 = vld [vmem:[%s597_s2] sm:$0x7]  ;;  %s496_s2 = scalar_lea.vmem %s307_s12, 384 }
  0x48   :  { %v152_v23 = vrot.slane %v139_v21, %v151_v20  ;;  %v144_v29 = vrot.slane %v139_v21, %v143_v27  ;;  %p497_p2 = scmp.ne.s32.totalorder %s307_s12, %s496_s2  ;;  %p502_p4 = scmp.lt.s32.totalorder %s496_s2, %s496_s2 }
  0x49   :  { %442 = vmatpush3.bf16.msra.mxu1 %v441_v41 }
  0x4a   :  { %386 = vmatpush1.bf16.msra.mxu0 %v385_v30  ;;  %444 = vmatprep.subr.bf16.mxu1 %v443_v43  ;;  %v148_v30 = vrot.slane %v139_v21, %v147_v28  ;;  %p503_p5 = por %p502_p4, %p501_p3 }
  0x4b   :  { %388 = vmatprep.subr.bf16.mxu0 %v387_v35 }
  0x4c   :  { %p504_p6 = pnand %p503_p5, %p497_p2 }
  0x4d   :  { %446 = vmatpush3.bf16.msra.mxu1 %v445_v51 }
  0x4e   :  { %390 = vmatpush1.bf16.msra.mxu0 %v389_v42 }
  0x4f   :  { %392 = vmatprep.subr.bf16.mxu0 %v391_v46 }
  0x50   :  { %292 = vmatmul.mubr.f32.vlgmr.msra.gmra.mrb[0].mxu1 %v41_v58 }
  0x52   :  { %394 = vmatpush1.bf16.msra.mxu0 %v393_v52 }
  0x53   :  { %396 = vmatprep.subr.bf16.mxu0 %v395_v53 }
  0x56   :  { %398 = vmatpush1.bf16.msra.mxu0 %v397_v59 }
  0x57   :  { %400 = vmatprep.subr.bf16.mxu0 %v399_v60 }
  0x5a   :  { %402 = vmatpush1.bf16.msra.mxu0 %v401_v1 }
  0x5b   :  { %404 = vmatprep.subr.bf16.mxu0 %v403_v2 }
  0x5e   :  { %406 = vmatpush1.bf16.msra.mxu0 %v405_v7 }
  0x5f   :  { %408 = vmatprep.subr.bf16.mxu0 %v407_v8 }
  0x62   :  { %410 = vmatpush1.bf16.msra.mxu0 %v409_v13 }
  0x63   :  { %412 = vmatprep.subr.bf16.mxu0 %v411_v14 }
  0x66   :  { %414 = vmatpush1.bf16.msra.mxu0 %v413_v17 }
  0x69   :  { %221 = vmatmul.mubr.f32.vlgmr.msra.gmra.mrb[0].mxu0 %v41_v58 }
 0x123   :  { %v348_v22 = vpop.f32.mrb[0].mxu1 }
 0x124   :  { %v349_v24 = vpop.f32.mrb[1].mxu1 }
 0x125   :  { %v350_v25 = vadd.f32 %v349_v24, %v348_v22 }
 0x127   :  { %v294_v26 = vadd.f32 %v350_v25, %v152_v23 }
 0x129   :  { %299 = vst [vmem:[#allocation7 + $0x10] sm:$0xff] %v294_v26 }
 0x13c   :  { %v222_v31 = vpop.f32.mrb[0].mxu0 }
 0x13d   :  { %v223_v32 = vadd.f32 %v222_v31, %v144_v29  ;;  %v224_v33 = vpop.f32.mrb[1].mxu0 }
 0x13e   :  { %v225_v34 = vadd.f32 %v224_v33, %v148_v30 }
 0x13f   :  { %297 = vst [vmem:[#allocation7] sm:$0xff] %v223_v32 }
 0x140   :  { %298 = vst [vmem:[#allocation7 + $0x8] sm:$0xff] %v225_v34 }
 0x141   :  { %507 = shalt.err (!%p504_p6)
}
 0x142   :  { %s508_s15 = scalar_lea.hbm %s598_s3, 384 }
 0x143   :  { %p509_p7 = scmp.ne.s32.totalorder %s598_s3, %s508_s15  ;;  %p512_p8 = scmp.lt.u32.totalorder %s508_s15, %s598_s3 }
 0x145   :  { %p514_p9 = pnand %p512_p8, %p509_p7 }
 0x147   :  { %517 = shalt.err (!%p514_p9)
}
 0x148   :  { %309 = dma.vmem_to_hbm [thread:$0]  %s307_s12, 384, %s598_s3, [#allocation4]  }
 0x149   :  { %522 = dma.done.wait [#allocation4], 384  }
 0x14a   :  { %523 = vsyncadd [#allocation4], 4294966912 }
 0x14b   :  { %313 = vsyncpa [#allocation3], 1 }
 0x14c   :  { %314 = vsyncpa [#allocation6], 1 }
 0x14d   :  { %315 = vsyncpa [#allocation4], 1 }

</bundles_post_ra>
